<compile_context>
chip_gen: v5e
topology: v5e:2x2
jax: 0.10.0
libtpu: 0.0.40
codegen_flags: <defaults>
</compile_context>

<pallas_src>
import functools

import jax
import jax.numpy as jnp
from jax.experimental import pallas as pl
from jax.experimental.pallas import tpu as pltpu

NEG_INF = -1e30  # bias for padded classes -> exp() underflows to 0 in logsumexp


def _mlp_logsoftmax_kernel(x_ref, w1_ref, b1_ref, w2_ref, b2_ref,
                           w3_ref, b3_ref, o_ref):
    # x tile: (TB, 512) f32 -> bf16 operands for the MXU, f32 accumulation.
    x = x_ref[...].astype(jnp.bfloat16)

    # fc1 + ReLU  -> (TB, 128)
    h1 = jnp.dot(x, w1_ref[...], preferred_element_type=jnp.float32) + b1_ref[...]
    h1 = jnp.maximum(h1, 0.0).astype(jnp.bfloat16)

    # fc2 + ReLU  -> (TB, 128); cols 64..127 are zero-padded and stay 0 after ReLU
    h2 = jnp.dot(h1, w2_ref[...], preferred_element_type=jnp.float32) + b2_ref[...]
    h2 = jnp.maximum(h2, 0.0).astype(jnp.bfloat16)

    # fc3 -> (TB, 128); padded classes carry bias -1e30 (zero weight columns),
    # so they contribute nothing to max / logsumexp below.
    logits = jnp.dot(h2, w3_ref[...], preferred_element_type=jnp.float32) + b3_ref[...]

    # Numerically stable log_softmax over the (padded) class dim.
    m = jnp.max(logits, axis=-1, keepdims=True)
    s = logits - m
    lse = jnp.log(jnp.sum(jnp.exp(s), axis=-1, keepdims=True))
    o_ref[...] = s - lse  # lane-dense (TB, 128) store


def _round_up(n, m):
    return ((n + m - 1) // m) * m


@functools.partial(jax.jit, static_argnames=("batch_tile",))
def classification_net_forward(x, w1, b1, w2, b2, w3, b3, *, batch_tile=256):
    """x: (B, 512) f32; w_i: (in, out); b_i: (1, out) or (out,). Returns (B, 51)."""
    B, D_in = x.shape
    H1 = w1.shape[1]              # 128
    H2 = w2.shape[1]              # 64
    C = w3.shape[1]               # 51 classes

    H2p = _round_up(H2, 128)      # 128
    Cp = _round_up(C, 128)        # 128

    # bf16 weights (halve weight HBM bytes, bf16-native MXU); f32 biases.
    w1p = w1.astype(jnp.bfloat16)                                         # (512,128)
    b1p = b1.reshape(1, H1).astype(jnp.float32)                           # (1,128)

    w2p = jnp.zeros((H1, H2p), jnp.bfloat16).at[:, :H2].set(w2.astype(jnp.bfloat16))
    b2p = jnp.zeros((1, H2p), jnp.float32).at[:, :H2].set(b2.reshape(1, H2))

    w3p = jnp.zeros((H2p, Cp), jnp.bfloat16).at[:H2, :C].set(w3.astype(jnp.bfloat16))
    b3p = jnp.full((1, Cp), NEG_INF, jnp.float32).at[:, :C].set(b3.reshape(1, C))

    # Batch tile: big enough to feed the MXU, clipped for small batches.
    TB = min(batch_tile, _round_up(B, 8))
    grid = (pl.cdiv(B, TB),)

    # Weights/biases: same block every grid step -> resident in VMEM (no re-DMA).
    resident = lambda shape: pl.BlockSpec(shape, lambda i: (0, 0))

    cost = pl.CostEstimate(
        flops=2 * B * (D_in * H1 + H1 * H2p + H2p * Cp),
        transcendentals=B * (Cp + 1),
        bytes_accessed=(w1p.size + w2p.size + w3p.size) * 2
        + (b1p.size + b2p.size + b3p.size) * 4
        + x.size * 4 + B * Cp * 4,
    )

    out = pl.pallas_call(
        _mlp_logsoftmax_kernel,
        out_shape=jax.ShapeDtypeStruct((B, Cp), jnp.float32),
        grid=grid,
        in_specs=[
            pl.BlockSpec((TB, D_in), lambda i: (i, 0)),   # x: batch-tiled, pipelined
            resident((D_in, H1)), resident((1, H1)),
            resident((H1, H2p)), resident((1, H2p)),
            resident((H2p, Cp)), resident((1, Cp)),
        ],
        out_specs=pl.BlockSpec((TB, Cp), lambda i: (i, 0)),
        compiler_params=pltpu.CompilerParams(
            dimension_semantics=("parallel",),            # shard batch over v7x's 2 TCs
        ),
        cost_estimate=cost,
    )(x, w1p, b1p, w2p, b2p, w3p, b3p)

    return out[:, :C]


def init_linear_params(key, in_features, out_features):
    """Deterministic PyTorch-default-style init: U(-1/sqrt(in), 1/sqrt(in))."""
    kw, kb = jax.random.split(key)
    bound = 1.0 / jnp.sqrt(jnp.float32(in_features))
    # stored as (in, out) so the kernel computes x @ W directly
    w = jax.random.uniform(kw, (in_features, out_features), jnp.float32,
                           minval=-bound, maxval=bound)
    b = jax.random.uniform(kb, (1, out_features), jnp.float32,
                           minval=-bound, maxval=bound)
    return w, b


if __name__ == "__main__":
    key = jax.random.PRNGKey(0)
    k_x, k1, k2, k3 = jax.random.split(key, 4)

    B = 8  # small batch; feature dim fixed at 512 by the module
    x = jax.random.normal(k_x, (B, 512), jnp.float32)

    w1, b1 = init_linear_params(k1, 512, 128)
    w2, b2 = init_linear_params(k2, 128, 64)
    w3, b3 = init_linear_params(k3, 64, 51)

    out = classification_net_forward(x, w1, b1, w2, b2, w3, b3)
    jax.block_until_ready(out)
    assert out.shape == (B, 51)

    # Pure-JAX reference mirroring the kernel's bf16-operand / f32-accumulate math.
    bf = lambda a: a.astype(jnp.bfloat16).astype(jnp.float32)
    h1 = jnp.maximum(bf(x) @ bf(w1) + b1, 0.0)
    h2 = jnp.maximum(bf(h1) @ bf(w2) + b2, 0.0)
    logits = bf(h2) @ bf(w3) + b3
    ref = jax.nn.log_softmax(logits, axis=-1)

    max_err = float(jnp.max(jnp.abs(out - ref)))
    assert jnp.allclose(out, ref, atol=5e-3, rtol=5e-3), max_err

    print("KERNEL_OK")
</pallas_src>

<mosaic_0001>
module attributes {stable_mosaic.version = 11 : i64} {
  func.func @_mlp_logsoftmax_kernel(%arg0: i32, %arg1: memref<8x512xf32, #tpu.memory_space<vmem>>, %arg2: memref<512x128xbf16, #tpu.memory_space<vmem>>, %arg3: memref<1x128xf32, #tpu.memory_space<vmem>>, %arg4: memref<128x128xbf16, #tpu.memory_space<vmem>>, %arg5: memref<1x128xf32, #tpu.memory_space<vmem>>, %arg6: memref<128x128xbf16, #tpu.memory_space<vmem>>, %arg7: memref<1x128xf32, #tpu.memory_space<vmem>>, %arg8: memref<8x128xf32, #tpu.memory_space<vmem>>) attributes {dimension_semantics = [#tpu.dimension_semantics<parallel>], iteration_bounds = array<i64: 1>, scalar_prefetch = 0 : i64, scratch_operands = 0 : i64, tpu.core_type = #tpu.core_type<tc>, window_params = [{transform_indices = @transform_0, window_bounds = array<i64: 8, 512>}, {pipeline_mode = #tpu.pipeline_mode<synchronous>, transform_indices = @transform_1, window_bounds = array<i64: 512, 128>}, {pipeline_mode = #tpu.pipeline_mode<synchronous>, transform_indices = @transform_2, window_bounds = array<i64: 1, 128>}, {pipeline_mode = #tpu.pipeline_mode<synchronous>, transform_indices = @transform_3, window_bounds = array<i64: 128, 128>}, {pipeline_mode = #tpu.pipeline_mode<synchronous>, transform_indices = @transform_4, window_bounds = array<i64: 1, 128>}, {pipeline_mode = #tpu.pipeline_mode<synchronous>, transform_indices = @transform_5, window_bounds = array<i64: 128, 128>}, {pipeline_mode = #tpu.pipeline_mode<synchronous>, transform_indices = @transform_6, window_bounds = array<i64: 1, 128>}, {transform_indices = @transform_7, window_bounds = array<i64: 8, 128>}]} {
    %c0 = arith.constant 0 : index
    %c0_0 = arith.constant 0 : index
    %0 = vector.load %arg1[%c0, %c0_0] : memref<8x512xf32, #tpu.memory_space<vmem>>, vector<8x512xf32>
    %1 = arith.truncf %0 : vector<8x512xf32> to vector<8x512xbf16>
    %c0_1 = arith.constant 0 : index
    %c0_2 = arith.constant 0 : index
    %2 = vector.load %arg2[%c0_1, %c0_2] : memref<512x128xbf16, #tpu.memory_space<vmem>>, vector<512x128xbf16>
    %cst = arith.constant dense<0.000000e+00> : vector<8x128xf32>
    %3 = tpu.matmul %1, %2, %cst {dimension_numbers = #tpu.dot_dimension_numbers<[1], [0], [0], [1], [0, 0, 1, 1], [], []>} : vector<8x512xbf16>, vector<512x128xbf16>, vector<8x128xf32> -> vector<8x128xf32>
    %c0_3 = arith.constant 0 : index
    %c0_4 = arith.constant 0 : index
    %4 = vector.load %arg3[%c0_3, %c0_4] : memref<1x128xf32, #tpu.memory_space<vmem>>, vector<1x128xf32>
    %5 = vector.broadcast %4 : vector<1x128xf32> to vector<8x128xf32>
    %6 = arith.addf %3, %5 : vector<8x128xf32>
    %cst_5 = arith.constant 0.000000e+00 : f32
    %7 = vector.broadcast %cst_5 : f32 to vector<8x128xf32>
    %8 = arith.maximumf %6, %7 : vector<8x128xf32>
    %9 = arith.truncf %8 : vector<8x128xf32> to vector<8x128xbf16>
    %c0_6 = arith.constant 0 : index
    %c0_7 = arith.constant 0 : index
    %10 = vector.load %arg4[%c0_6, %c0_7] : memref<128x128xbf16, #tpu.memory_space<vmem>>, vector<128x128xbf16>
    %cst_8 = arith.constant dense<0.000000e+00> : vector<8x128xf32>
    %11 = tpu.matmul %9, %10, %cst_8 {dimension_numbers = #tpu.dot_dimension_numbers<[1], [0], [0], [1], [0, 0, 1, 1], [], []>} : vector<8x128xbf16>, vector<128x128xbf16>, vector<8x128xf32> -> vector<8x128xf32>
    %c0_9 = arith.constant 0 : index
    %c0_10 = arith.constant 0 : index
    %12 = vector.load %arg5[%c0_9, %c0_10] : memref<1x128xf32, #tpu.memory_space<vmem>>, vector<1x128xf32>
    %13 = vector.broadcast %12 : vector<1x128xf32> to vector<8x128xf32>
    %14 = arith.addf %11, %13 : vector<8x128xf32>
    %cst_11 = arith.constant 0.000000e+00 : f32
    %15 = vector.broadcast %cst_11 : f32 to vector<8x128xf32>
    %16 = arith.maximumf %14, %15 : vector<8x128xf32>
    %17 = arith.truncf %16 : vector<8x128xf32> to vector<8x128xbf16>
    %c0_12 = arith.constant 0 : index
    %c0_13 = arith.constant 0 : index
    %18 = vector.load %arg6[%c0_12, %c0_13] : memref<128x128xbf16, #tpu.memory_space<vmem>>, vector<128x128xbf16>
    %cst_14 = arith.constant dense<0.000000e+00> : vector<8x128xf32>
    %19 = tpu.matmul %17, %18, %cst_14 {dimension_numbers = #tpu.dot_dimension_numbers<[1], [0], [0], [1], [0, 0, 1, 1], [], []>} : vector<8x128xbf16>, vector<128x128xbf16>, vector<8x128xf32> -> vector<8x128xf32>
    %c0_15 = arith.constant 0 : index
    %c0_16 = arith.constant 0 : index
    %20 = vector.load %arg7[%c0_15, %c0_16] : memref<1x128xf32, #tpu.memory_space<vmem>>, vector<1x128xf32>
    %21 = vector.broadcast %20 : vector<1x128xf32> to vector<8x128xf32>
    %22 = arith.addf %19, %21 : vector<8x128xf32>
    %cst_17 = arith.constant dense<0xFF800000> : vector<8xf32>
    %23 = vector.multi_reduction <maximumf>, %22, %cst_17 [1] : vector<8x128xf32> to vector<8xf32>
    %24 = vector.shape_cast %23 : vector<8xf32> to vector<8x1xf32>
    %25 = vector.broadcast %24 : vector<8x1xf32> to vector<8x128xf32>
    %26 = arith.subf %22, %25 : vector<8x128xf32>
    %27 = math.exp %26 : vector<8x128xf32>
    %cst_18 = arith.constant dense<0.000000e+00> : vector<8xf32>
    %28 = vector.multi_reduction <add>, %27, %cst_18 [1] : vector<8x128xf32> to vector<8xf32>
    %29 = vector.shape_cast %28 : vector<8xf32> to vector<8x1xf32>
    %30 = math.log %29 : vector<8x1xf32>
    %31 = vector.broadcast %30 : vector<8x1xf32> to vector<8x128xf32>
    %32 = arith.subf %26, %31 : vector<8x128xf32>
    %c0_19 = arith.constant 0 : index
    %c0_20 = arith.constant 0 : index
    %33 = vector.load %arg8[%c0_19, %c0_20] : memref<8x128xf32, #tpu.memory_space<vmem>>, vector<8x128xf32>
    tpu.vector_store %arg8[%c0_19, %c0_20], %32 {strides = array<i32>} : memref<8x128xf32, #tpu.memory_space<vmem>>, vector<8x128xf32>,
    return
  }
  func.func @transform_0(%arg0: i32) -> (i32, i32) {
    %c0_i32 = arith.constant 0 : i32
    %c0_i32_0 = arith.constant 0 : i32
    return %arg0, %c0_i32 : i32, i32
  }
  func.func @transform_1(%arg0: i32) -> (i32, i32) {
    %c0_i32 = arith.constant 0 : i32
    %c0_i32_0 = arith.constant 0 : i32
    %c0_i32_1 = arith.constant 0 : i32
    return %c0_i32, %c0_i32_0 : i32, i32
  }
  func.func @transform_2(%arg0: i32) -> (i32, i32) {
    %c0_i32 = arith.constant 0 : i32
    %c0_i32_0 = arith.constant 0 : i32
    %c0_i32_1 = arith.constant 0 : i32
    return %c0_i32, %c0_i32_0 : i32, i32
  }
  func.func @transform_3(%arg0: i32) -> (i32, i32) {
    %c0_i32 = arith.constant 0 : i32
    %c0_i32_0 = arith.constant 0 : i32
    %c0_i32_1 = arith.constant 0 : i32
    return %c0_i32, %c0_i32_0 : i32, i32
  }
  func.func @transform_4(%arg0: i32) -> (i32, i32) {
    %c0_i32 = arith.constant 0 : i32
    %c0_i32_0 = arith.constant 0 : i32
    %c0_i32_1 = arith.constant 0 : i32
    return %c0_i32, %c0_i32_0 : i32, i32
  }
  func.func @transform_5(%arg0: i32) -> (i32, i32) {
    %c0_i32 = arith.constant 0 : i32
    %c0_i32_0 = arith.constant 0 : i32
    %c0_i32_1 = arith.constant 0 : i32
    return %c0_i32, %c0_i32_0 : i32, i32
  }
  func.func @transform_6(%arg0: i32) -> (i32, i32) {
    %c0_i32 = arith.constant 0 : i32
    %c0_i32_0 = arith.constant 0 : i32
    %c0_i32_1 = arith.constant 0 : i32
    return %c0_i32, %c0_i32_0 : i32, i32
  }
  func.func @transform_7(%arg0: i32) -> (i32, i32) {
    %c0_i32 = arith.constant 0 : i32
    %c0_i32_0 = arith.constant 0 : i32
    return %arg0, %c0_i32 : i32, i32
  }
}

</mosaic_0001>

<bundles_post_ra>
// kernel: classification_net_forward.1
= control target key start
LH: loop header
LB: loop body
LE: loop exit
PB: predicated region body
PF: predicated region fallthrough
CT: control target
= control target key end

     0   :  { %s1023_s0 = inlined_call_operand.vmem [shape: f32[8,512], index: 0, kind: input, shape index: {}]   ;;  %s1024_s1 = inlined_call_operand.vmem [shape: bf16[512,128], index: 1, kind: input, shape index: {}]   ;;  %s1025_s2 = inlined_call_operand.vmem [shape: f32[1,128], index: 2, kind: input, shape index: {}]   ;;  %s1026_s3 = inlined_call_operand.vmem [shape: bf16[128,128], index: 3, kind: input, shape index: {}]   ;;  %s1027_s4 = inlined_call_operand.vmem [shape: f32[1,128], index: 4, kind: input, shape index: {}]   ;;  %s1028_s5 = inlined_call_operand.vmem [shape: bf16[128,128], index: 5, kind: input, shape index: {}]   ;;  %s1029_s6 = inlined_call_operand.vmem [shape: f32[1,128], index: 6, kind: input, shape index: {}]   ;;  %s1030_s7 = inlined_call_operand.hbm [shape: f32[8,128], index: 7, kind: output, shape index: {}]  }
   0x1   :  { %v739_v0 = vld [vmem:[%s1024_s1 + $0x38] sm:$0xff]  ;;  %v738_v4 = vld [vmem:[%s1024_s1 + $0x30] sm:$0xff]  ;;  %v737_v8 = vld [vmem:[%s1024_s1 + $0x28] sm:$0xff] }
   0x2   :  { %v747_v1 = vld [vmem:[%s1024_s1 + $0x78] sm:$0xff]  ;;  %295 = vmatpush.bf16.msra.mxu0 %v739_v0  ;;  %v746_v5 = vld [vmem:[%s1024_s1 + $0x70] sm:$0xff]  ;;  %v745_v9 = vld [vmem:[%s1024_s1 + $0x68] sm:$0xff] }
   0x3   :  { %v755_v2 = vld [vmem:[%s1024_s1 + $0xb8] sm:$0xff]  ;;  %308 = vmatpush.bf16.msra.mxu1 %v747_v1  ;;  %v754_v6 = vld [vmem:[%s1024_s1 + $0xb0] sm:$0xff]  ;;  %v753_v10 = vld [vmem:[%s1024_s1 + $0xa8] sm:$0xff] }
   0x4   :  { %v763_v3 = vld [vmem:[%s1024_s1 + $0xf8] sm:$0xff]  ;;  %321 = vmatpush.bf16.msra.mxu2 %v755_v2  ;;  %v762_v7 = vld [vmem:[%s1024_s1 + $0xf0] sm:$0xff]  ;;  %v761_v11 = vld [vmem:[%s1024_s1 + $0xe8] sm:$0xff] }
   0x5   :  { %334 = vmatpush.bf16.msra.mxu3 %v763_v3  ;;  %v736_v12 = vld [vmem:[%s1024_s1 + $0x20] sm:$0xff]  ;;  %v735_v16 = vld [vmem:[%s1024_s1 + $0x18] sm:$0xff] }
   0x6   :  { %296 = vmatpush.bf16.msra.mxu0 %v738_v4  ;;  %v744_v13 = vld [vmem:[%s1024_s1 + $0x60] sm:$0xff]  ;;  %v743_v17 = vld [vmem:[%s1024_s1 + $0x58] sm:$0xff] }
   0x7   :  { %309 = vmatpush.bf16.msra.mxu1 %v746_v5  ;;  %v752_v14 = vld [vmem:[%s1024_s1 + $0xa0] sm:$0xff] }
   0x8   :  { %322 = vmatpush.bf16.msra.mxu2 %v754_v6  ;;  %v760_v15 = vld [vmem:[%s1024_s1 + $0xe0] sm:$0xff] }
   0x9   :  { %335 = vmatpush.bf16.msra.mxu3 %v762_v7 }
   0xa   :  { %297 = vmatpush.bf16.msra.mxu0 %v737_v8 }
   0xb   :  { %310 = vmatpush.bf16.msra.mxu1 %v745_v9 }
   0xc   :  { %323 = vmatpush.bf16.msra.mxu2 %v753_v10 }
   0xd   :  { %336 = vmatpush.bf16.msra.mxu3 %v761_v11 }
   0xe   :  { %298 = vmatpush.bf16.msra.mxu0 %v736_v12 }
   0xf   :  { %311 = vmatpush.bf16.msra.mxu1 %v744_v13 }
  0x10   :  { %12 = vsyncpa [#allocation3], 0  ;;  %324 = vmatpush.bf16.msra.mxu2 %v752_v14  ;;  %v751_v18 = vld [vmem:[%s1024_s1 + $0x98] sm:$0xff]  ;;  %v734_v20 = vld [vmem:[%s1024_s1 + $0x10] sm:$0xff]  ;;  %s531_s15 = sshll.u32 %s1030_s7, 4  ;;  %s532_s15 = int_to_ptr.hbm [resolvable:$true] %s531_s15 }
  0x11   :  { %337 = vmatpush.bf16.msra.mxu3 %v760_v15  ;;  %v759_v19 = vld [vmem:[%s1024_s1 + $0xd8] sm:$0xff]  ;;  %v742_v21 = vld [vmem:[%s1024_s1 + $0x50] sm:$0xff]  ;;  %v733_v24 = vld [vmem:[%s1024_s1 + $0x8] sm:$0xff] }
  0x12   :  { %299 = vmatpush.bf16.msra.mxu0 %v735_v16  ;;  %v750_v22 = vld [vmem:[%s1024_s1 + $0x90] sm:$0xff]  ;;  %v741_v25 = vld [vmem:[%s1024_s1 + $0x48] sm:$0xff]  ;;  %v732_v28 = vld [vmem:[%s1024_s1] sm:$0xff] }
  0x13   :  { %312 = vmatpush.bf16.msra.mxu1 %v743_v17  ;;  %v758_v23 = vld [vmem:[%s1024_s1 + $0xd0] sm:$0xff]  ;;  %v749_v26 = vld [vmem:[%s1024_s1 + $0x88] sm:$0xff]  ;;  %v740_v29 = vld [vmem:[%s1024_s1 + $0x40] sm:$0xff] }
  0x14   :  { %325 = vmatpush.bf16.msra.mxu2 %v751_v18  ;;  %v757_v27 = vld [vmem:[%s1024_s1 + $0xc8] sm:$0xff]  ;;  %v748_v30 = vld [vmem:[%s1024_s1 + $0x80] sm:$0xff]  ;;  %v29_v34 = vld [vmem:[%s1023_s0 + $0x10] sm:$0xff] }
  0x15   :  { %338 = vmatpush.bf16.msra.mxu3 %v759_v19  ;;  %v27_v31 = vld [vmem:[%s1023_s0] sm:$0xff]  ;;  %v28_v32 = vld [vmem:[%s1023_s0 + $0x8] sm:$0xff]  ;;  %v30_v35 = vld [vmem:[%s1023_s0 + $0x18] sm:$0xff]  ;;  %v33_v39 = vpack.c.bf16 %v29_v34, %v29_v34 }
  0x16   :  { %300 = vmatpush.bf16.msra.mxu0 %v734_v20  ;;  %v756_v33 = vld [vmem:[%s1024_s1 + $0xc0] sm:$0xff]  ;;  %v771_v36 = vld [vmem:[%s1026_s3 + $0x38] sm:$0xff]  ;;  %v31_v37 = vpack.c.bf16 %v27_v31, %v27_v31  ;;  %v32_v38 = vpack.c.bf16 %v28_v32, %v28_v32  ;;  %v34_v40 = vpack.c.bf16 %v30_v35, %v30_v35  ;;  %v770_v41 = vld [vmem:[%s1026_s3 + $0x30] sm:$0xff] }
  0x17   :  { %313 = vmatpush.bf16.msra.mxu1 %v742_v21  ;;  %v769_v42 = vld [vmem:[%s1026_s3 + $0x28] sm:$0xff]  ;;  %v768_v43 = vld [vmem:[%s1026_s3 + $0x20] sm:$0xff]  ;;  %v767_v44 = vld [vmem:[%s1026_s3 + $0x18] sm:$0xff] }
  0x18   :  { %326 = vmatpush.bf16.msra.mxu2 %v750_v22  ;;  %v766_v45 = vld [vmem:[%s1026_s3 + $0x10] sm:$0xff]  ;;  %v765_v46 = vld [vmem:[%s1026_s3 + $0x8] sm:$0xff]  ;;  %v764_v47 = vld [vmem:[%s1026_s3] sm:$0xff] }
  0x19   :  { %339 = vmatpush.bf16.msra.mxu3 %v758_v23  ;;  %v779_v48 = vld [vmem:[%s1028_s5 + $0x38] sm:$0xff]  ;;  %v778_v49 = vld [vmem:[%s1028_s5 + $0x30] sm:$0xff]  ;;  %v777_v50 = vld [vmem:[%s1028_s5 + $0x28] sm:$0xff] }
  0x1a   :  { %301 = vmatpush.bf16.msra.mxu0 %v733_v24  ;;  %v776_v51 = vld [vmem:[%s1028_s5 + $0x20] sm:$0xff]  ;;  %v775_v53 = vld [vmem:[%s1028_s5 + $0x18] sm:$0xff]  ;;  %v774_v57 = vld [vmem:[%s1028_s5 + $0x10] sm:$0xff] }
  0x1b   :  { %314 = vmatpush.bf16.msra.mxu1 %v741_v25  ;;  %v781_v52 = vld [vmem:[%s1025_s2] ss:$0 sm:$0xff]  ;;  %v773_v5 = vld [vmem:[%s1028_s5 + $0x8] sm:$0xff] }
  0x1c   :  { %327 = vmatpush.bf16.msra.mxu2 %v749_v26  ;;  %v772_v6 = vld [vmem:[%s1028_s5] sm:$0xff] }
  0x1d   :  { %340 = vmatpush.bf16.msra.mxu3 %v757_v27  ;;  %v782_v7 = vld [vmem:[%s1027_s4] ss:$0 sm:$0xff]  ;;  %s814_s4 = smov [#allocation2]  }
  0x1e   :  { %302 = vmatpush.bf16.msra.mxu0 %v732_v28  ;;  %v783_v13 = vld [vmem:[%s1029_s6] ss:$0 sm:$0xff]  ;;  %s529_s5 = sshll.u32 %s814_s4, 4  ;;  %s530_s5 = int_to_ptr.vmem [resolvable:$true] %s529_s5 }
  0x1f   :  { %315 = vmatpush.bf16.msra.mxu1 %v740_v29 }
  0x20   :  { %328 = vmatpush.bf16.msra.mxu2 %v748_v30 }
  0x21   :  { %341 = vmatpush.bf16.msra.mxu3 %v756_v33  ;;  %303 = vmatmul.bf16.vlgmr.msra.gmra.mxu0 %v31_v37 }
  0x22   :  { %417 = vmatpush.bf16.msrb.mxu0 %v771_v36  ;;  %316 = vmatmul.bf16.vlgmr.msra.gmra.mxu1 %v32_v38 }
  0x23   :  { %329 = vmatmul.bf16.vlgmr.msra.gmra.mxu2 %v33_v39  ;;  %500 = vmatpush.bf16.msrb.mxu1 %v779_v48 }
  0x24   :  { %342 = vmatmul.bf16.vlgmr.msra.gmra.mxu3 %v34_v40 }
  0x26   :  { %418 = vmatpush.bf16.msrb.mxu0 %v770_v41 }
  0x27   :  { %501 = vmatpush.bf16.msrb.mxu1 %v778_v49 }
  0x2a   :  { %419 = vmatpush.bf16.msrb.mxu0 %v769_v42 }
  0x2b   :  { %502 = vmatpush.bf16.msrb.mxu1 %v777_v50 }
  0x2e   :  { %420 = vmatpush.bf16.msrb.mxu0 %v768_v43 }
  0x2f   :  { %503 = vmatpush.bf16.msrb.mxu1 %v776_v51 }
  0x32   :  { %421 = vmatpush.bf16.msrb.mxu0 %v767_v44 }
  0x33   :  { %504 = vmatpush.bf16.msrb.mxu1 %v775_v53 }
  0x36   :  { %422 = vmatpush.bf16.msrb.mxu0 %v766_v45 }
  0x37   :  { %505 = vmatpush.bf16.msrb.mxu1 %v774_v57 }
  0x3a   :  { %423 = vmatpush.bf16.msrb.mxu0 %v765_v46 }
  0x3b   :  { %506 = vmatpush.bf16.msrb.mxu1 %v773_v5 }
  0x3e   :  { %424 = vmatpush.bf16.msrb.mxu0 %v764_v47 }
  0x3f   :  { %507 = vmatpush.bf16.msrb.mxu1 %v772_v6 }
  0x9e   :  { %v304_v54 = vpop.f32.mrf.mxu0 }
  0x9f   :  { %v317_v55 = vpop.f32.mrf.mxu1  ;;  %v305_v56 = vadd.f32 %v781_v52, %v304_v54 }
  0xa1   :  { %v318_v58 = vadd.f32 %v317_v55, %v305_v56 }
  0xa6   :  { %v330_v59 = vpop.f32.mrf.mxu2  ;;  %v306_v62 = vpop.f32.mrf.mxu0 }
  0xa7   :  { %v343_v60 = vpop.f32.mrf.mxu3  ;;  %v331_v61 = vadd.f32 %v330_v59, %v318_v58  ;;  %v319_v63 = vpop.f32.mrf.mxu1 }
  0xa9   :  { %v344_v0 = vadd.f32 %v343_v60, %v331_v61 }
  0xab   :  { %v347_v1 = vmax.f32 %v344_v0, 0.0 }
  0xad   :  { %v348_v2 = vpack.c.bf16 %v347_v1, %v347_v1 }
  0xae   :  { %v332_v3 = vpop.f32.mrf.mxu2 }
  0xaf   :  { %v345_v4 = vpop.f32.mrf.mxu3  ;;  %425 = vmatmul.bf16.vlgmr.msrb.gmra.mxu0 %v348_v2 }
 0x12c   :  { %v426_v8 = vpop.f32.mrf.mxu0 }
 0x12d   :  { %v427_v9 = vadd.f32 %v782_v7, %v426_v8 }
 0x12f   :  { %v430_v10 = vmax.f32 %v427_v9, 0.0 }
 0x131   :  { %v431_v11 = vpack.c.bf16 %v430_v10, %v430_v10 }
 0x133   :  { %508 = vmatmul.bf16.vlgmr.msrb.gmra.mxu1 %v431_v11 }
 0x134   :  { %v428_v12 = vpop.f32.mrf.mxu0 }
 0x1b0   :  { %v509_v14 = vpop.f32.mrf.mxu1 }
 0x1b1   :  { %v510_v15 = vadd.f32 %v783_v13, %v509_v14 }
 0x1b3   :  { %513 = vmax.xlane.f32.xlu0 %v510_v15 }
 0x1b8   :  { %v511_v16 = vpop.f32.mrf.mxu1 }
 0x226   :  { %v514_v17 = vpop.xlane.xlu0 %513 }
 0x227   :  { %v515_v18 = vsub.f32 %v510_v15, %v514_v17 }
 0x229   :  { %v516_v19 = vmul.f32 1.442695, %v515_v18 }
 0x22b   :  { %784 = vpow2.f32 %v516_v19 }
 0x231   :  { %v785_v20 = vpop.eup %784 }
 0x232   :  { %518 = vadd.xlane.f32.xlu0 %v785_v20 }
 0x2a5   :  { %v519_v21 = vpop.xlane.xlu0 %518 }
 0x2a6   :  { %786 = vlog2.f32 %v519_v21 }
 0x2ac   :  { %v787_v22 = vpop.eup %786 }
 0x2ad   :  { %v521_v23 = vmul.f32 0.6931472, %v787_v22 }
 0x2af   :  { %v522_v24 = vsub.f32 %v515_v18, %v521_v23 }
 0x2b1   :  { %523 = vst [vmem:[#allocation2] sm:$0xff] %v522_v24 }
 0x2b2   :  { %534 = dma.vmem_to_hbm [thread:$0]  %s530_s5, 128, %s532_s15, [#allocation3]  }
 0x2b3   :  { %812 = dma.done.wait [#allocation3], 128  }
 0x2b4   :  { %813 = vsyncadd [#allocation3], 4294967168 }
 0x2b5   :  { %539 = vsyncpa [#allocation3], 1 }

</bundles_post_ra>
